<compile_context>
chip_gen: v6e
topology: v6e:2x2x1
jax: 0.10.0
libtpu: 0.0.40
codegen_flags: <defaults>
</compile_context>

<pallas_src>
import functools

import jax
import jax.numpy as jnp
from jax.experimental import pallas as pl
from jax.experimental.pallas import tpu as pltpu


# ----------------------------------------------------------------------------
# Generic M-tiled matmul kernels (pipelined over row tiles)
# ----------------------------------------------------------------------------

def _linear_kernel(x_ref, w_ref, b_ref, o_ref):
    # o = x @ w + b      x:[tm,K]  w:[K,N]  b:[1,N]
    o_ref[...] = (
        jnp.dot(x_ref[...], w_ref[...], preferred_element_type=jnp.float32)
        + b_ref[...]
    )


def pallas_linear(x, w, b, tile_m=2048):
    m, k = x.shape
    nout = w.shape[1]
    tm = min(tile_m, m)
    return pl.pallas_call(
        _linear_kernel,
        out_shape=jax.ShapeDtypeStruct((m, nout), jnp.float32),
        grid_spec=pltpu.PrefetchScalarGridSpec(
            num_scalar_prefetch=0,
            grid=(pl.cdiv(m, tm),),
            in_specs=[
                pl.BlockSpec((tm, k), lambda i: (i, 0)),
                pl.BlockSpec((k, nout), lambda i: (0, 0)),
                pl.BlockSpec((1, nout), lambda i: (0, 0)),
            ],
            out_specs=pl.BlockSpec((tm, nout), lambda i: (i, 0)),
        ),
        compiler_params=pltpu.CompilerParams(dimension_semantics=("parallel",)),
    )(x, w, b.reshape(1, nout))


def _sem_score_kernel(x_ref, w_ref, b_ref, q_ref, o_ref):
    # semantic-attention score: tanh(x @ W + b) @ q
    proj = jnp.tanh(
        jnp.dot(x_ref[...], w_ref[...], preferred_element_type=jnp.float32)
        + b_ref[...]
    )
    o_ref[...] = jnp.dot(proj, q_ref[...], preferred_element_type=jnp.float32)


def pallas_sem_score(flat, w, b, q, tile_m=2048):
    m, d = flat.shape
    sub = w.shape[1]
    tm = min(tile_m, m)
    return pl.pallas_call(
        _sem_score_kernel,
        out_shape=jax.ShapeDtypeStruct((m, 1), jnp.float32),
        grid_spec=pltpu.PrefetchScalarGridSpec(
            num_scalar_prefetch=0,
            grid=(pl.cdiv(m, tm),),
            in_specs=[
                pl.BlockSpec((tm, d), lambda i: (i, 0)),
                pl.BlockSpec((d, sub), lambda i: (0, 0)),
                pl.BlockSpec((1, sub), lambda i: (0, 0)),
                pl.BlockSpec((sub, 1), lambda i: (0, 0)),
            ],
            out_specs=pl.BlockSpec((tm, 1), lambda i: (i, 0)),
        ),
        compiler_params=pltpu.CompilerParams(dimension_semantics=("parallel",)),
    )(flat, w, b.reshape(1, sub), q.reshape(sub, 1))


def _head_kernel(inv_t, s_ref, w_ref, b_ref, o_ref):
    # outputs = (sum_t(gru + lstm) / T) @ W_out + b_out
    feat = s_ref[...] * inv_t
    o_ref[...] = (
        jnp.dot(feat, w_ref[...], preferred_element_type=jnp.float32)
        + b_ref[...]
    )


def pallas_head(rnn_sum, w_out, b_out, t_steps):
    n = rnn_sum.shape[0]
    d = w_out.shape[1]
    return pl.pallas_call(
        functools.partial(_head_kernel, 1.0 / float(t_steps)),
        out_shape=jax.ShapeDtypeStruct((n, d), jnp.float32),
    )(rnn_sum, w_out, b_out.reshape(1, d))


# ----------------------------------------------------------------------------
# 1) Per-edge-type projections (time-invariant, hoisted out of the snapshot
#    loop).  Emits per-head feature slabs and the rank-1 attention factors
#    el / er instead of the full [heads, N, N] logits.
# ----------------------------------------------------------------------------

def _proj_kernel(node_heads, x_ref, wgat_ref, wgcn_ref, al_ref, ar_ref,
                 hgat_ref, xwgcn_ref, el_ref, er_ref):
    x = x_ref[...]                                             # [N, D]
    xwgcn_ref[0] = jnp.dot(x, wgcn_ref[0], preferred_element_type=jnp.float32)
    for hi in range(node_heads):
        hh = jnp.dot(x, wgat_ref[0, hi],
                     preferred_element_type=jnp.float32)      # [N, hd]
        hgat_ref[0, hi] = hh
        el_ref[0, hi] = jnp.sum(hh * al_ref[0, hi], axis=-1, keepdims=True)
        er_ref[0, hi] = jnp.sum(hh * ar_ref[0, hi], axis=-1, keepdims=True)


def pallas_edge_projections(x, w_gat_h, w_gcn, a_l_h, a_r_h, node_heads):
    # w_gat_h: [R, heads, D, hd]   a_l_h / a_r_h: [R, heads, 1, hd]
    n, d = x.shape
    r, heads, _, hd = w_gat_h.shape
    nd = w_gcn.shape[-1]
    return pl.pallas_call(
        functools.partial(_proj_kernel, node_heads),
        out_shape=(
            jax.ShapeDtypeStruct((r, heads, n, hd), jnp.float32),  # per-head H_gat
            jax.ShapeDtypeStruct((r, n, nd), jnp.float32),         # X @ W_gcn
            jax.ShapeDtypeStruct((r, heads, n, 1), jnp.float32),   # el factor
            jax.ShapeDtypeStruct((r, heads, n, 1), jnp.float32),   # er factor
        ),
        grid_spec=pltpu.PrefetchScalarGridSpec(
            num_scalar_prefetch=0,
            grid=(r,),
            in_specs=[
                pl.BlockSpec((n, d), lambda ri: (0, 0)),
                pl.BlockSpec((1, heads, d, hd), lambda ri: (ri, 0, 0, 0)),
                pl.BlockSpec((1, d, nd), lambda ri: (ri, 0, 0)),
                pl.BlockSpec((1, heads, 1, hd), lambda ri: (ri, 0, 0, 0)),
                pl.BlockSpec((1, heads, 1, hd), lambda ri: (ri, 0, 0, 0)),
            ],
            out_specs=(
                pl.BlockSpec((1, heads, n, hd), lambda ri: (ri, 0, 0, 0)),
                pl.BlockSpec((1, n, nd), lambda ri: (ri, 0, 0)),
                pl.BlockSpec((1, heads, n, 1), lambda ri: (ri, 0, 0, 0)),
                pl.BlockSpec((1, heads, n, 1), lambda ri: (ri, 0, 0, 0)),
            ),
        ),
        compiler_params=pltpu.CompilerParams(dimension_semantics=("parallel",)),
    )(x, w_gat_h, w_gcn, a_l_h, a_r_h)


# ----------------------------------------------------------------------------
# 2) Fused graph stage: grid = (R, T, KB).  Key-axis tiled, online softmax,
#    logits recomputed from rank-1 el/er factors, bf16 A+I stream,
#    post-matmul normalization with approximate reciprocals.
# ----------------------------------------------------------------------------

def _graph_kernel(node_heads, adj_ref, hgat_ref, xwgcn_ref, el_ref, er_ref,
                  gat_ref, gcn_ref, m_sc, l_sc, acc_sc, gsum_sc, gacc_sc):
    kb = pl.program_id(2)
    nkb = pl.num_programs(2)

    @pl.when(kb == 0)
    def _():
        m_sc[...] = jnp.full_like(m_sc, -1e30)
        l_sc[...] = jnp.zeros_like(l_sc)
        acc_sc[...] = jnp.zeros_like(acc_sc)
        gsum_sc[...] = jnp.zeros_like(gsum_sc)
        gacc_sc[...] = jnp.zeros_like(gacc_sc)

    a_hat = adj_ref[0, 0].astype(jnp.float32)      # [N, tk]  (A + I, bf16 -> f32)
    mask = a_hat > 0.0

    # ---- multi-head GAT: online softmax over key blocks ----
    for hi in range(node_heads):
        # recompute logits from rank-1 factors: LeakyReLU(el_i + er_j)
        e = el_ref[0, hi] + er_ref[0, hi]          # [N,1] + [1,tk] -> [N,tk]
        e = jnp.where(e > 0, e, 0.2 * e)           # LeakyReLU(0.2)
        e = jnp.where(mask, e, -1e30)
        m_prev = m_sc[hi]                          # [N, 1]
        m_new = jnp.maximum(m_prev, jnp.max(e, axis=-1, keepdims=True))
        scale = jnp.exp(m_prev - m_new)
        # masked entries underflow to exactly 0 after the max subtraction;
        # no second select needed.
        p = jnp.exp(e - m_new)
        l_sc[hi] = scale * l_sc[hi] + jnp.sum(p, axis=-1, keepdims=True)
        acc_sc[hi] = scale * acc_sc[hi] + jnp.dot(
            p, hgat_ref[0, hi], preferred_element_type=jnp.float32)
        m_sc[hi] = m_new

    # ---- GCN partial sums: accumulate (A+I) @ (X W) and the row sums ----
    gacc_sc[...] = gacc_sc[...] + jnp.dot(
        a_hat, xwgcn_ref[0], preferred_element_type=jnp.float32)
    gsum_sc[...] = gsum_sc[...] + jnp.sum(a_hat, axis=-1, keepdims=True)

    @pl.when(kb == nkb - 1)
    def _():
        # normalize after the matmul (N*hd multiplies + EUP reciprocal)
        head_outs = []
        for hi in range(node_heads):
            inv_l = pl.reciprocal(l_sc[hi], approx=True)
            head_outs.append(acc_sc[hi] * inv_l)
        gat = jnp.concatenate(head_outs, axis=-1)              # [N, nd]
        gat = jnp.where(gat > 0, gat, jnp.exp(gat) - 1.0)      # ELU
        gat_ref[0, 0] = gat

        inv_d = pl.reciprocal(gsum_sc[...], approx=True)
        gcn_ref[0, 0] = jnp.maximum(gacc_sc[...] * inv_d, 0.0)  # relu(D^-1(A+I)XW)


def pallas_graph_stage(graphs_hat, h_gat, xw_gcn, el, er_t, node_heads, key_tile):
    t, r, n, _ = graphs_hat.shape
    heads, hd = h_gat.shape[1], h_gat.shape[3]
    nd = heads * hd
    assert n % key_tile == 0
    nkb = n // key_tile
    return pl.pallas_call(
        functools.partial(_graph_kernel, node_heads),
        out_shape=(
            jax.ShapeDtypeStruct((t, r, n, nd), jnp.float32),
            jax.ShapeDtypeStruct((t, r, n, nd), jnp.float32),
        ),
        grid_spec=pltpu.PrefetchScalarGridSpec(
            num_scalar_prefetch=0,
            # NOTE(v7x): keep R (or T) even so the parallel axes split cleanly
            # across the two TensorCores.
            grid=(r, t, nkb),
            in_specs=[
                pl.BlockSpec((1, 1, n, key_tile), lambda ri, ti, kb: (ti, ri, 0, kb)),
                pl.BlockSpec((1, heads, key_tile, hd), lambda ri, ti, kb: (ri, 0, kb, 0)),
                pl.BlockSpec((1, key_tile, nd), lambda ri, ti, kb: (ri, kb, 0)),
                pl.BlockSpec((1, heads, n, 1), lambda ri, ti, kb: (ri, 0, 0, 0)),
                pl.BlockSpec((1, heads, 1, key_tile), lambda ri, ti, kb: (ri, 0, 0, kb)),
            ],
            out_specs=(
                pl.BlockSpec((1, 1, n, nd), lambda ri, ti, kb: (ti, ri, 0, 0)),
                pl.BlockSpec((1, 1, n, nd), lambda ri, ti, kb: (ti, ri, 0, 0)),
            ),
            scratch_shapes=[
                pltpu.VMEM((heads, n, 1), jnp.float32),   # running max per head
                pltpu.VMEM((heads, n, 1), jnp.float32),   # running denom per head
                pltpu.VMEM((heads, n, hd), jnp.float32),  # per-head GAT accumulator
                pltpu.VMEM((n, 1), jnp.float32),          # GCN degree (row sum)
                pltpu.VMEM((n, nd), jnp.float32),         # GCN accumulator
            ],
        ),
        compiler_params=pltpu.CompilerParams(
            dimension_semantics=("parallel", "parallel", "arbitrary")),
    )(graphs_hat, h_gat, xw_gcn, el, er_t)


# ----------------------------------------------------------------------------
# 3) Temporal GRU + LSTM: hoisted input projection, gate-major layouts,
#    in-kernel temporal-mean accumulator.
# ----------------------------------------------------------------------------

def _rnn_kernel(gx_ref, wh_ref, gru_ref, lstm_ref, sum_ref, hg_sc, hl_sc, cl_sc):
    t = pl.program_id(0)

    @pl.when(t == 0)
    def _():
        hg_sc[...] = jnp.zeros_like(hg_sc)
        hl_sc[...] = jnp.zeros_like(hl_sc)
        cl_sc[...] = jnp.zeros_like(cl_sc)
        sum_ref[...] = jnp.zeros_like(sum_ref)

    gx = gx_ref[0]                               # [7, N, H]  gate-major input proj
    hg = hg_sc[...]
    hl = hl_sc[...]
    cl = cl_sc[...]

    def rec(k, h):                               # [N,H] @ [H,H], gate-major weight
        return jnp.dot(h, wh_ref[k], preferred_element_type=jnp.float32)

    # ---- GRU (gates r, z, n) ----
    r = jax.nn.sigmoid(gx[0] + rec(0, hg))
    z = jax.nn.sigmoid(gx[1] + rec(1, hg))
    nn_ = jnp.tanh(gx[2] + r * rec(2, hg))
    hg_new = (1.0 - z) * nn_ + z * hg

    # ---- LSTM (gates i, f, g, o) ----
    i = jax.nn.sigmoid(gx[3] + rec(3, hl))
    f = jax.nn.sigmoid(gx[4] + rec(4, hl))
    g = jnp.tanh(gx[5] + rec(5, hl))
    o = jax.nn.sigmoid(gx[6] + rec(6, hl))
    c_new = f * cl + i * g
    hl_new = o * jnp.tanh(c_new)

    hg_sc[...] = hg_new
    hl_sc[...] = hl_new
    cl_sc[...] = c_new
    gru_ref[0] = hg_new
    lstm_ref[0] = hl_new
    sum_ref[...] = sum_ref[...] + hg_new + hl_new   # running sum for the mean


def pallas_gru_lstm(x_seq, wx_g, wh_g, b_g, wx_l, wh_l, b_l):
    t, n, d = x_seq.shape
    h = wh_g.shape[0]

    # input projection hoisted out of the recurrence: one tiled [T*N, D] @ [D, 7H]
    wx = jnp.concatenate([wx_g, wx_l], axis=1)                 # [D, 7H]
    bx = jnp.concatenate([b_g, b_l], axis=0)                   # [7H]
    gx_all = pallas_linear(x_seq.reshape(t * n, d), wx, bx)
    # gate-major layout [T, 7, N, H]: each gate is a lane-aligned slab
    gx_all = gx_all.reshape(t, n, 7, h).transpose(0, 2, 1, 3)

    # gate-major recurrent weights [7, H, H]: 0..2 GRU (r,z,n), 3..6 LSTM (i,f,g,o)
    wh_all = jnp.concatenate([
        wh_g.reshape(h, 3, h).transpose(1, 0, 2),
        wh_l.reshape(h, 4, h).transpose(1, 0, 2),
    ], axis=0)

    return pl.pallas_call(
        _rnn_kernel,
        out_shape=(
            jax.ShapeDtypeStruct((t, n, h), jnp.float32),      # gru_seq (time-major)
            jax.ShapeDtypeStruct((t, n, h), jnp.float32),      # lstm_seq (time-major)
            jax.ShapeDtypeStruct((n, h), jnp.float32),         # sum_t(gru + lstm)
        ),
        grid_spec=pltpu.PrefetchScalarGridSpec(
            num_scalar_prefetch=0,
            grid=(t,),
            in_specs=[
                pl.BlockSpec((1, 7, n, h), lambda i: (i, 0, 0, 0)),
                pl.BlockSpec((7, h, h), lambda i: (0, 0, 0)),
            ],
            out_specs=(
                pl.BlockSpec((1, n, h), lambda i: (i, 0, 0)),
                pl.BlockSpec((1, n, h), lambda i: (i, 0, 0)),
                pl.BlockSpec((n, h), lambda i: (0, 0)),
            ),
            scratch_shapes=[
                pltpu.VMEM((n, h), jnp.float32),
                pltpu.VMEM((n, h), jnp.float32),
                pltpu.VMEM((n, h), jnp.float32),
            ],
        ),
        compiler_params=pltpu.CompilerParams(dimension_semantics=("arbitrary",)),
    )(gx_all, wh_all)


# ----------------------------------------------------------------------------
# Model: parameter construction + forward pass (glue in plain JAX)
# ----------------------------------------------------------------------------

def init_params(key, node_num, dim, node_dim, node_heads, type_num,
                edge_sub_dim, rnn_input_dim, rnn_output_dim):
    ks = iter(jax.random.split(key, 32))
    p = {}
    p["embedding"] = 0.1 * jax.random.normal(next(ks), (node_num, dim), jnp.float32)
    head_dim = node_dim // node_heads
    p["W_gat"] = 0.1 * jax.random.normal(next(ks), (type_num, dim, node_dim), jnp.float32)
    p["a_l"] = 0.1 * jax.random.normal(next(ks), (type_num, node_heads, head_dim), jnp.float32)
    p["a_r"] = 0.1 * jax.random.normal(next(ks), (type_num, node_heads, head_dim), jnp.float32)
    p["W_gcn"] = 0.1 * jax.random.normal(next(ks), (type_num, dim, node_dim), jnp.float32)
    # edge-type (semantic) attention MLPs
    p["W_eatt"] = 0.1 * jax.random.normal(next(ks), (node_dim, edge_sub_dim), jnp.float32)
    p["b_eatt"] = jnp.zeros((edge_sub_dim,), jnp.float32)
    p["q_eatt"] = 0.1 * jax.random.normal(next(ks), (edge_sub_dim,), jnp.float32)
    p["W_egcn"] = 0.1 * jax.random.normal(next(ks), (node_dim, edge_sub_dim), jnp.float32)
    p["b_egcn"] = jnp.zeros((edge_sub_dim,), jnp.float32)
    p["q_egcn"] = 0.1 * jax.random.normal(next(ks), (edge_sub_dim,), jnp.float32)
    # temporal GRU + LSTM
    hdim = rnn_output_dim
    p["Wx_gru"] = 0.1 * jax.random.normal(next(ks), (rnn_input_dim, 3 * hdim), jnp.float32)
    p["Wh_gru"] = 0.1 * jax.random.normal(next(ks), (hdim, 3 * hdim), jnp.float32)
    p["b_gru"] = jnp.zeros((3 * hdim,), jnp.float32)
    p["Wx_lstm"] = 0.1 * jax.random.normal(next(ks), (rnn_input_dim, 4 * hdim), jnp.float32)
    p["Wh_lstm"] = 0.1 * jax.random.normal(next(ks), (hdim, 4 * hdim), jnp.float32)
    p["b_lstm"] = jnp.zeros((4 * hdim,), jnp.float32)
    # output head
    p["W_out"] = 0.1 * jax.random.normal(next(ks), (dim, dim), jnp.float32)
    p["b_out"] = jnp.zeros((dim,), jnp.float32)
    return p


def _type_attention_batched(stack, w_e, b_e, q_e):
    # semantic attention over edge types; one tiled batched matmul for all (t, r, n)
    t, r, n, d = stack.shape
    scores = pallas_sem_score(stack.reshape(t * r * n, d), w_e, b_e, q_e)
    scores = scores.reshape(t, r, n).mean(axis=-1)             # [T, R]
    beta = jax.nn.softmax(scores, axis=-1)                     # [T, R]
    combined = jnp.einsum("tr,trnd->tnd", beta, stack)         # [T, N, D]
    return combined


def _pick_key_tile(n):
    for cand in (512, 1024, 256, 128):
        if n % cand == 0:
            return cand
    return n


def dyh_forward(graphs, params, node_heads, key_tile=None):
    t_snaps, r_types, n, _ = graphs.shape
    x = params["embedding"]

    # adjacency + self loops folded on the host, streamed as bf16 (exact for 0/1/2)
    eye = jnp.eye(n, dtype=graphs.dtype)
    graphs_hat = (graphs + eye).astype(jnp.bfloat16)           # [T, R, N, N]

    # per-head slab layouts for the GAT projection weights (one-time, host side)
    tn, d, nd = params["W_gat"].shape
    hd = nd // node_heads
    w_gat_h = params["W_gat"].reshape(tn, d, node_heads, hd).transpose(0, 2, 1, 3)
    a_l_h = params["a_l"].reshape(tn, node_heads, 1, hd)
    a_r_h = params["a_r"].reshape(tn, node_heads, 1, hd)

    # 1) hoisted per-edge-type projections (independent of t); rank-1 el/er only
    h_gat, xw_gcn, el, er = pallas_edge_projections(
        x, w_gat_h, params["W_gcn"], a_l_h, a_r_h, node_heads)
    er_t = jnp.transpose(er, (0, 1, 3, 2))                     # [R, heads, 1, N]

    # 2) fused, key-axis-tiled graph stage over all (t, r)
    if key_tile is None:
        key_tile = _pick_key_tile(n)
    gat_all, gcn_all = pallas_graph_stage(
        graphs_hat, h_gat, xw_gcn, el, er_t, node_heads, key_tile)
    # gat_all / gcn_all: [T, R, N, node_dim]

    node_gat_list = [gat_all[ti] for ti in range(t_snaps)]
    node_gcn_list = [gcn_all[ti] for ti in range(t_snaps)]

    # 3) edge-type semantic attention (batched + M-tiled)
    comb_att = _type_attention_batched(gat_all, params["W_eatt"],
                                       params["b_eatt"], params["q_eatt"])
    comb_gcn = _type_attention_batched(gcn_all, params["W_egcn"],
                                       params["b_egcn"], params["q_egcn"])
    edge_att_list = [comb_att[ti] for ti in range(t_snaps)]
    edge_gcn_list = [comb_gcn[ti] for ti in range(t_snaps)]

    x_seq = comb_att + comb_gcn                                # [T, N, dim] time-major
    snap_features = jnp.transpose(x_seq, (1, 0, 2))            # [N, T, dim]

    # 4) temporal GRU + LSTM; temporal mean accumulated in-kernel
    gru_seq, lstm_seq, rnn_sum = pallas_gru_lstm(
        x_seq, params["Wx_gru"], params["Wh_gru"], params["b_gru"],
        params["Wx_lstm"], params["Wh_lstm"], params["b_lstm"])
    gru_f = jnp.transpose(gru_seq, (1, 0, 2))                  # [N, T, H]
    lstm_f = jnp.transpose(lstm_seq, (1, 0, 2))                # [N, T, H]

    # 5) outputs = Linear(dim, dim)((gru_f + lstm_f).mean(1))
    outputs = pallas_head(rnn_sum, params["W_out"], params["b_out"], t_snaps)

    return (node_gat_list, node_gcn_list, edge_att_list, edge_gcn_list,
            snap_features, gru_f, lstm_f, outputs)


# ----------------------------------------------------------------------------

if __name__ == "__main__":
    # small, constructor-consistent sizes
    NODE_NUM = 8
    DIM = 32
    NODE_DIM = 32
    NODE_HEADS = 2
    TYPE_NUM = 2
    EDGE_SUB_DIM = 16
    RNN_INPUT_DIM = 32
    RNN_OUTPUT_DIM = 32
    T_SNAPSHOTS = 3

    key = jax.random.PRNGKey(0)
    k_params, k_graph = jax.random.split(key)

    params = init_params(k_params, NODE_NUM, DIM, NODE_DIM, NODE_HEADS,
                         TYPE_NUM, EDGE_SUB_DIM, RNN_INPUT_DIM, RNN_OUTPUT_DIM)

    graphs = jax.random.bernoulli(
        k_graph, 0.4, (T_SNAPSHOTS, TYPE_NUM, NODE_NUM, NODE_NUM)
    ).astype(jnp.float32)

    result = dyh_forward(graphs, params, NODE_HEADS)
    jax.block_until_ready(result)

    outputs = result[-1]
    assert outputs.shape == (NODE_NUM, DIM)
    assert result[4].shape == (NODE_NUM, T_SNAPSHOTS, NODE_DIM)        # snap_features
    assert result[5].shape == (NODE_NUM, T_SNAPSHOTS, RNN_OUTPUT_DIM)  # gru_f
    assert bool(jnp.all(jnp.isfinite(outputs)))
    print("KERNEL_OK")
</pallas_src>

<mosaic_0001>
module attributes {stable_mosaic.version = 11 : i64} {
  func.func @_proj_kernel(%arg0: i32, %arg1: memref<8x32xf32, #tpu.memory_space<vmem>>, %arg2: memref<1x2x32x16xf32, #tpu.memory_space<vmem>>, %arg3: memref<1x32x32xf32, #tpu.memory_space<vmem>>, %arg4: memref<1x2x1x16xf32, #tpu.memory_space<vmem>>, %arg5: memref<1x2x1x16xf32, #tpu.memory_space<vmem>>, %arg6: memref<1x2x8x16xf32, #tpu.memory_space<vmem>>, %arg7: memref<1x8x32xf32, #tpu.memory_space<vmem>>, %arg8: memref<1x2x8x1xf32, #tpu.memory_space<vmem>>, %arg9: memref<1x2x8x1xf32, #tpu.memory_space<vmem>>) attributes {dimension_semantics = [#tpu.dimension_semantics<parallel>], iteration_bounds = array<i64: 2>, scalar_prefetch = 0 : i64, scratch_operands = 0 : i64, tpu.core_type = #tpu.core_type<tc>, window_params = [{pipeline_mode = #tpu.pipeline_mode<synchronous>, transform_indices = @transform_0, window_bounds = array<i64: 8, 32>}, {transform_indices = @transform_1, window_bounds = array<i64: 1, 2, 32, 16>}, {transform_indices = @transform_2, window_bounds = array<i64: 1, 32, 32>}, {transform_indices = @transform_3, window_bounds = array<i64: 1, 2, 1, 16>}, {transform_indices = @transform_4, window_bounds = array<i64: 1, 2, 1, 16>}, {transform_indices = @transform_5, window_bounds = array<i64: 1, 2, 8, 16>}, {transform_indices = @transform_6, window_bounds = array<i64: 1, 8, 32>}, {transform_indices = @transform_7, window_bounds = array<i64: 1, 2, 8, 1>}, {transform_indices = @transform_8, window_bounds = array<i64: 1, 2, 8, 1>}]} {
    %c0 = arith.constant 0 : index
    %c0_0 = arith.constant 0 : index
    %0 = vector.load %arg1[%c0, %c0_0] : memref<8x32xf32, #tpu.memory_space<vmem>>, vector<8x32xf32>
    %c0_1 = arith.constant 0 : index
    %c0_2 = arith.constant 0 : index
    %c0_3 = arith.constant 0 : index
    %1 = vector.load %arg3[%c0_1, %c0_2, %c0_3] : memref<1x32x32xf32, #tpu.memory_space<vmem>>, vector<1x32x32xf32>
    %2 = vector.shape_cast %1 : vector<1x32x32xf32> to vector<32x32xf32>
    %cst = arith.constant dense<0.000000e+00> : vector<8x32xf32>
    %3 = tpu.matmul %0, %2, %cst {dimension_numbers = #tpu.dot_dimension_numbers<[1], [0], [0], [1], [0, 0, 1, 1], [], []>} : vector<8x32xf32>, vector<32x32xf32>, vector<8x32xf32> -> vector<8x32xf32>
    %c0_4 = arith.constant 0 : index
    %c0_5 = arith.constant 0 : index
    %c0_6 = arith.constant 0 : index
    %4 = vector.load %arg7[%c0_4, %c0_5, %c0_6] : memref<1x8x32xf32, #tpu.memory_space<vmem>>, vector<1x8x32xf32>
    %5 = vector.shape_cast %4 : vector<1x8x32xf32> to vector<8x32xf32>
    %6 = vector.shape_cast %3 : vector<8x32xf32> to vector<1x8x32xf32>
    tpu.vector_store %arg7[%c0_4, %c0_5, %c0_6], %6 {strides = array<i32>} : memref<1x8x32xf32, #tpu.memory_space<vmem>>, vector<1x8x32xf32>,
    %c0_7 = arith.constant 0 : index
    %c0_8 = arith.constant 0 : index
    %c0_9 = arith.constant 0 : index
    %c0_10 = arith.constant 0 : index
    %7 = vector.load %arg2[%c0_7, %c0_8, %c0_9, %c0_10] : memref<1x2x32x16xf32, #tpu.memory_space<vmem>>, vector<1x1x32x16xf32>
    %8 = vector.shape_cast %7 : vector<1x1x32x16xf32> to vector<32x16xf32>
    %cst_11 = arith.constant dense<0.000000e+00> : vector<8x16xf32>
    %9 = tpu.matmul %0, %8, %cst_11 {dimension_numbers = #tpu.dot_dimension_numbers<[1], [0], [0], [1], [0, 0, 1, 1], [], []>} : vector<8x32xf32>, vector<32x16xf32>, vector<8x16xf32> -> vector<8x16xf32>
    %c0_12 = arith.constant 0 : index
    %c0_13 = arith.constant 0 : index
    %c0_14 = arith.constant 0 : index
    %c0_15 = arith.constant 0 : index
    %10 = vector.load %arg6[%c0_12, %c0_13, %c0_14, %c0_15] : memref<1x2x8x16xf32, #tpu.memory_space<vmem>>, vector<1x1x8x16xf32>
    %11 = vector.shape_cast %10 : vector<1x1x8x16xf32> to vector<8x16xf32>
    %12 = vector.shape_cast %9 : vector<8x16xf32> to vector<1x1x8x16xf32>
    tpu.vector_store %arg6[%c0_12, %c0_13, %c0_14, %c0_15], %12 {strides = array<i32>} : memref<1x2x8x16xf32, #tpu.memory_space<vmem>>, vector<1x1x8x16xf32>,
    %c0_16 = arith.constant 0 : index
    %c0_17 = arith.constant 0 : index
    %c0_18 = arith.constant 0 : index
    %c0_19 = arith.constant 0 : index
    %13 = vector.load %arg4[%c0_16, %c0_17, %c0_18, %c0_19] : memref<1x2x1x16xf32, #tpu.memory_space<vmem>>, vector<1x1x1x16xf32>
    %14 = vector.shape_cast %13 : vector<1x1x1x16xf32> to vector<1x16xf32>
    %15 = vector.broadcast %14 : vector<1x16xf32> to vector<8x16xf32>
    %16 = arith.mulf %9, %15 : vector<8x16xf32>
    %cst_20 = arith.constant dense<0.000000e+00> : vector<8xf32>
    %17 = vector.multi_reduction <add>, %16, %cst_20 [1] : vector<8x16xf32> to vector<8xf32>
    %18 = vector.shape_cast %17 : vector<8xf32> to vector<8x1xf32>
    %c0_21 = arith.constant 0 : index
    %c0_22 = arith.constant 0 : index
    %c0_23 = arith.constant 0 : index
    %c0_24 = arith.constant 0 : index
    %19 = vector.load %arg8[%c0_21, %c0_22, %c0_23, %c0_24] : memref<1x2x8x1xf32, #tpu.memory_space<vmem>>, vector<1x1x8x1xf32>
    %20 = vector.shape_cast %19 : vector<1x1x8x1xf32> to vector<8x1xf32>
    %21 = vector.shape_cast %18 : vector<8x1xf32> to vector<1x1x8x1xf32>
    tpu.vector_store %arg8[%c0_21, %c0_22, %c0_23, %c0_24], %21 {strides = array<i32>} : memref<1x2x8x1xf32, #tpu.memory_space<vmem>>, vector<1x1x8x1xf32>,
    %c0_25 = arith.constant 0 : index
    %c0_26 = arith.constant 0 : index
    %c0_27 = arith.constant 0 : index
    %c0_28 = arith.constant 0 : index
    %22 = vector.load %arg5[%c0_25, %c0_26, %c0_27, %c0_28] : memref<1x2x1x16xf32, #tpu.memory_space<vmem>>, vector<1x1x1x16xf32>
    %23 = vector.shape_cast %22 : vector<1x1x1x16xf32> to vector<1x16xf32>
    %24 = vector.broadcast %23 : vector<1x16xf32> to vector<8x16xf32>
    %25 = arith.mulf %9, %24 : vector<8x16xf32>
    %cst_29 = arith.constant dense<0.000000e+00> : vector<8xf32>
    %26 = vector.multi_reduction <add>, %25, %cst_29 [1] : vector<8x16xf32> to vector<8xf32>
    %27 = vector.shape_cast %26 : vector<8xf32> to vector<8x1xf32>
    %c0_30 = arith.constant 0 : index
    %c0_31 = arith.constant 0 : index
    %c0_32 = arith.constant 0 : index
    %c0_33 = arith.constant 0 : index
    %28 = vector.load %arg9[%c0_30, %c0_31, %c0_32, %c0_33] : memref<1x2x8x1xf32, #tpu.memory_space<vmem>>, vector<1x1x8x1xf32>
    %29 = vector.shape_cast %28 : vector<1x1x8x1xf32> to vector<8x1xf32>
    %30 = vector.shape_cast %27 : vector<8x1xf32> to vector<1x1x8x1xf32>
    tpu.vector_store %arg9[%c0_30, %c0_31, %c0_32, %c0_33], %30 {strides = array<i32>} : memref<1x2x8x1xf32, #tpu.memory_space<vmem>>, vector<1x1x8x1xf32>,
    %c0_34 = arith.constant 0 : index
    %c1 = arith.constant 1 : index
    %c0_35 = arith.constant 0 : index
    %c0_36 = arith.constant 0 : index
    %31 = vector.load %arg2[%c0_34, %c1, %c0_35, %c0_36] : memref<1x2x32x16xf32, #tpu.memory_space<vmem>>, vector<1x1x32x16xf32>
    %32 = vector.shape_cast %31 : vector<1x1x32x16xf32> to vector<32x16xf32>
    %cst_37 = arith.constant dense<0.000000e+00> : vector<8x16xf32>
    %33 = tpu.matmul %0, %32, %cst_37 {dimension_numbers = #tpu.dot_dimension_numbers<[1], [0], [0], [1], [0, 0, 1, 1], [], []>} : vector<8x32xf32>, vector<32x16xf32>, vector<8x16xf32> -> vector<8x16xf32>
    %c0_38 = arith.constant 0 : index
    %c1_39 = arith.constant 1 : index
    %c0_40 = arith.constant 0 : index
    %c0_41 = arith.constant 0 : index
    %34 = vector.load %arg6[%c0_38, %c1_39, %c0_40, %c0_41] : memref<1x2x8x16xf32, #tpu.memory_space<vmem>>, vector<1x1x8x16xf32>
    %35 = vector.shape_cast %34 : vector<1x1x8x16xf32> to vector<8x16xf32>
    %36 = vector.shape_cast %33 : vector<8x16xf32> to vector<1x1x8x16xf32>
    tpu.vector_store %arg6[%c0_38, %c1_39, %c0_40, %c0_41], %36 {strides = array<i32>} : memref<1x2x8x16xf32, #tpu.memory_space<vmem>>, vector<1x1x8x16xf32>,
    %c0_42 = arith.constant 0 : index
    %c1_43 = arith.constant 1 : index
    %c0_44 = arith.constant 0 : index
    %c0_45 = arith.constant 0 : index
    %37 = vector.load %arg4[%c0_42, %c1_43, %c0_44, %c0_45] : memref<1x2x1x16xf32, #tpu.memory_space<vmem>>, vector<1x1x1x16xf32>
    %38 = vector.shape_cast %37 : vector<1x1x1x16xf32> to vector<1x16xf32>
    %39 = vector.broadcast %38 : vector<1x16xf32> to vector<8x16xf32>
    %40 = arith.mulf %33, %39 : vector<8x16xf32>
    %cst_46 = arith.constant dense<0.000000e+00> : vector<8xf32>
    %41 = vector.multi_reduction <add>, %40, %cst_46 [1] : vector<8x16xf32> to vector<8xf32>
    %42 = vector.shape_cast %41 : vector<8xf32> to vector<8x1xf32>
    %c0_47 = arith.constant 0 : index
    %c1_48 = arith.constant 1 : index
    %c0_49 = arith.constant 0 : index
    %c0_50 = arith.constant 0 : index
    %43 = vector.load %arg8[%c0_47, %c1_48, %c0_49, %c0_50] : memref<1x2x8x1xf32, #tpu.memory_space<vmem>>, vector<1x1x8x1xf32>
    %44 = vector.shape_cast %43 : vector<1x1x8x1xf32> to vector<8x1xf32>
    %45 = vector.shape_cast %42 : vector<8x1xf32> to vector<1x1x8x1xf32>
    tpu.vector_store %arg8[%c0_47, %c1_48, %c0_49, %c0_50], %45 {strides = array<i32>} : memref<1x2x8x1xf32, #tpu.memory_space<vmem>>, vector<1x1x8x1xf32>,
    %c0_51 = arith.constant 0 : index
    %c1_52 = arith.constant 1 : index
    %c0_53 = arith.constant 0 : index
    %c0_54 = arith.constant 0 : index
    %46 = vector.load %arg5[%c0_51, %c1_52, %c0_53, %c0_54] : memref<1x2x1x16xf32, #tpu.memory_space<vmem>>, vector<1x1x1x16xf32>
    %47 = vector.shape_cast %46 : vector<1x1x1x16xf32> to vector<1x16xf32>
    %48 = vector.broadcast %47 : vector<1x16xf32> to vector<8x16xf32>
    %49 = arith.mulf %33, %48 : vector<8x16xf32>
    %cst_55 = arith.constant dense<0.000000e+00> : vector<8xf32>
    %50 = vector.multi_reduction <add>, %49, %cst_55 [1] : vector<8x16xf32> to vector<8xf32>
    %51 = vector.shape_cast %50 : vector<8xf32> to vector<8x1xf32>
    %c0_56 = arith.constant 0 : index
    %c1_57 = arith.constant 1 : index
    %c0_58 = arith.constant 0 : index
    %c0_59 = arith.constant 0 : index
    %52 = vector.load %arg9[%c0_56, %c1_57, %c0_58, %c0_59] : memref<1x2x8x1xf32, #tpu.memory_space<vmem>>, vector<1x1x8x1xf32>
    %53 = vector.shape_cast %52 : vector<1x1x8x1xf32> to vector<8x1xf32>
    %54 = vector.shape_cast %51 : vector<8x1xf32> to vector<1x1x8x1xf32>
    tpu.vector_store %arg9[%c0_56, %c1_57, %c0_58, %c0_59], %54 {strides = array<i32>} : memref<1x2x8x1xf32, #tpu.memory_space<vmem>>, vector<1x1x8x1xf32>,
    return
  }
  func.func @transform_0(%arg0: i32) -> (i32, i32) {
    %c0_i32 = arith.constant 0 : i32
    %c0_i32_0 = arith.constant 0 : i32
    %c0_i32_1 = arith.constant 0 : i32
    return %c0_i32, %c0_i32_0 : i32, i32
  }
  func.func @transform_1(%arg0: i32) -> (i32, i32, i32, i32) {
    %c0_i32 = arith.constant 0 : i32
    %c0_i32_0 = arith.constant 0 : i32
    %c0_i32_1 = arith.constant 0 : i32
    %c0_i32_2 = arith.constant 0 : i32
    return %arg0, %c0_i32, %c0_i32_0, %c0_i32_1 : i32, i32, i32, i32
  }
  func.func @transform_2(%arg0: i32) -> (i32, i32, i32) {
    %c0_i32 = arith.constant 0 : i32
    %c0_i32_0 = arith.constant 0 : i32
    %c0_i32_1 = arith.constant 0 : i32
    return %arg0, %c0_i32, %c0_i32_0 : i32, i32, i32
  }
  func.func @transform_3(%arg0: i32) -> (i32, i32, i32, i32) {
    %c0_i32 = arith.constant 0 : i32
    %c0_i32_0 = arith.constant 0 : i32
    %c0_i32_1 = arith.constant 0 : i32
    %c0_i32_2 = arith.constant 0 : i32
    return %arg0, %c0_i32, %c0_i32_0, %c0_i32_1 : i32, i32, i32, i32
  }
  func.func @transform_4(%arg0: i32) -> (i32, i32, i32, i32) {
    %c0_i32 = arith.constant 0 : i32
    %c0_i32_0 = arith.constant 0 : i32
    %c0_i32_1 = arith.constant 0 : i32
    %c0_i32_2 = arith.constant 0 : i32
    return %arg0, %c0_i32, %c0_i32_0, %c0_i32_1 : i32, i32, i32, i32
  }
  func.func @transform_5(%arg0: i32) -> (i32, i32, i32, i32) {
    %c0_i32 = arith.constant 0 : i32
    %c0_i32_0 = arith.constant 0 : i32
    %c0_i32_1 = arith.constant 0 : i32
    %c0_i32_2 = arith.constant 0 : i32
    return %arg0, %c0_i32, %c0_i32_0, %c0_i32_1 : i32, i32, i32, i32
  }
  func.func @transform_6(%arg0: i32) -> (i32, i32, i32) {
    %c0_i32 = arith.constant 0 : i32
    %c0_i32_0 = arith.constant 0 : i32
    %c0_i32_1 = arith.constant 0 : i32
    return %arg0, %c0_i32, %c0_i32_0 : i32, i32, i32
  }
  func.func @transform_7(%arg0: i32) -> (i32, i32, i32, i32) {
    %c0_i32 = arith.constant 0 : i32
    %c0_i32_0 = arith.constant 0 : i32
    %c0_i32_1 = arith.constant 0 : i32
    %c0_i32_2 = arith.constant 0 : i32
    return %arg0, %c0_i32, %c0_i32_0, %c0_i32_1 : i32, i32, i32, i32
  }
  func.func @transform_8(%arg0: i32) -> (i32, i32, i32, i32) {
    %c0_i32 = arith.constant 0 : i32
    %c0_i32_0 = arith.constant 0 : i32
    %c0_i32_1 = arith.constant 0 : i32
    %c0_i32_2 = arith.constant 0 : i32
    return %arg0, %c0_i32, %c0_i32_0, %c0_i32_1 : i32, i32, i32, i32
  }
}

</mosaic_0001>

<bundles_post_ra>
// kernel: tpu_custom_call.1
= control target key start
LH: loop header
LB: loop body
LE: loop exit
PB: predicated region body
PF: predicated region fallthrough
CT: control target
= control target key end

     0   :  { %s1366_s0 = inlined_call_operand.vmem [shape: f32[8,32], index: 0, kind: input, shape index: {}]   ;;  %s1367_s1 = inlined_call_operand.vmem [shape: f32[2,2,32,16], index: 1, kind: input, shape index: {}]   ;;  %s1368_s2 = inlined_call_operand.vmem [shape: f32[2,32,32], index: 2, kind: input, shape index: {}]   ;;  %s1369_s3 = inlined_call_operand.vmem [shape: f32[2,2,1,16], index: 3, kind: input, shape index: {}]   ;;  %s1370_s4 = inlined_call_operand.vmem [shape: f32[2,2,1,16], index: 4, kind: input, shape index: {}]   ;;  %s1371_s5 = inlined_call_operand.hbm [shape: f32[2,2,8,16], index: 5, kind: output, shape index: {0}]   ;;  %s1372_s6 = inlined_call_operand.hbm [shape: f32[2,8,32], index: 6, kind: output, shape index: {1}]   ;;  %s1373_s7 = inlined_call_operand.vmem [shape: f32[2,2,8,1], index: 7, kind: output, shape index: {2}]   ;;  %s1374_s8 = inlined_call_operand.vmem [shape: f32[2,2,8,1], index: 8, kind: output, shape index: {3}]  }
   0x1   :  { %1375 = sst [smem:[#allocation8_spill]] %s1366_s0 }
   0x2   :  { %1376 = sst [smem:[#allocation9_spill]] %s1367_s1 }
   0x3   :  { %1377 = sst [smem:[#allocation10_spill]] %s1368_s2 }
   0x4   :  { %1378 = sst [smem:[#allocation11_spill]] %s1369_s3 }
   0x5   :  { %1379 = sst [smem:[#allocation12_spill]] %s1370_s4 }
   0x6   :  { %14 = vsyncpa [#allocation3], 0 }
   0x7   :  { %16 = vsyncpa [#allocation3 + $0x1], 0 }
   0x8   :  { %17 = vsyncpa [#allocation5], 0 }
   0x9   :  { %19 = vsyncpa [#allocation5 + $0x1], 0  ;;  %s1190_s27 = smov 0   ;;  %s1192_s28 = smov 0  }
   0xa   :  { %s1194_s29 = smov 0   ;;  %s1196_s30 = smov 0  }
   0xb LB: > { %s1211_s9 = sadd.s32 4294967295, %s1137_s30   ;;  %s907_s10 = sadd.s32 4294967294, %s1137_s30   ;;  %s1137_s30 = sphi %s1196_s30, %s1392_s30   ;;  %s1133_s29 = sphi %s1194_s29, %s1391_s29   ;;  %s1129_s28 = sphi %s1192_s28, %s1390_s28   ;;  %s1125_s27 = sphi %s1190_s27, %s1389_s27  }
   0xc   : > { %s1215_s11 = sadd.s32 1, %s1137_s30   ;;  %s157_s12 = sadd.s32 1, %s1133_s29 }
   0xd   : > { %s154_s13 = ssub.s32 %s1137_s30, %s1215_s11  ;;  %p167_p0 = scmp.ne.s32.totalorder %s1133_s29, %s1129_s28 }
   0xe   : > { %p155_p1 = scmp.eq.s32.totalorder %s154_s13, 0  ;;  %p168_p2 = scmp.eq.s32.totalorder %s1211_s9, 1 }
   0xf   : > { %p173_p3 = scmp.ne.s32.totalorder %s1129_s28, %s1125_s27  ;;  %p174_p4 = scmp.eq.s32.totalorder %s907_s10, 1 }
  0x10   : > { %s1226_s14 = scalar_select %p155_p1, %s1133_s29, %s157_s12  }
  0x11   : > { %p1228_p5 = por %p168_p2, %p167_p0  ;;  %p1232_p6 = por %p174_p4, %p173_p3 }
  0x12   : > { %p910_p7 = scmp.ge.s32.totalorder %s1137_s30, 1  ;;  %p303_p8 = scmp.lt.s32.totalorder %s1137_s30, 3 }
  0x14   : > { %p304_p9 = pnand %p910_p7, %p303_p8 }
  0x15   : > { %p365_p10 = scmp.lt.s32.totalorder (!%p304_p9), %s1211_s9, 1  ;;  %s1382_s2 = sld [smem:[#allocation10_spill]] (!%p304_p9) }
  0x16   : > { %307 = sbr.rel (%p304_p9) target bundleno = 386 (0x182), region = 40  ;;  %s1383_s1 = sld [smem:[#allocation9_spill]] (!%p304_p9) }
  0x17   : > { %s1384_s0 = sld [smem:[#allocation8_spill]] (!%p304_p9)  ;;  %s1270_s12 = sand.u32 (!%p304_p9), 1, %s1129_s28  }
  0x18   : > { %s1385_s3 = sld [smem:[#allocation11_spill]] (!%p304_p9) }
  0x19   : > { %s1386_s4 = sld [smem:[#allocation12_spill]] (!%p304_p9) }
  0x1b   : > { %v1139_v0 = vmov 0.0   ;;  %s1240_s17 = scalar_select %p365_p10, %s1211_s9, 1  ;;  %vm1140_vm0 = vmmov 0   ;;  %vm398_vm1 = vcmask 261120   ;;  %vm547_vm2 = vcmask 130048  }
  0x1c   : > { %966 = vmatprep.subr.mxu0 %v1139_v0  ;;  %977 = vmatprep.subr.mxu1 %v1139_v0 }
  0x1d   : > { %974 = vmatprep.mubr.msk.f32.mxu0 %vm1140_vm0, %v1139_v0  ;;  %985 = vmatprep.mubr.msk.f32.mxu1 %vm1140_vm0, %v1139_v0  ;;  %s947_s18 = sshll.u32 %s1240_s17, 5  ;;  %s946_s19 = sshll.u32 %s1240_s17, 6  ;;  %v393_v8 = vld [vmem:[%s1384_s0] sm:$0xff] }
  0x1e   : > { %s374_s22 = scalar_lea.vmem %s1382_s2, %s947_s18  ;;  %s1252_s25 = scalar_lea.vmem %s1383_s1, %s946_s19 }
  0x1f   : > { %v397_v1 = vld [vmem:[%s374_s22 + $0x18] sm:$0xff]  ;;  %v396_v2 = vld [vmem:[%s374_s22 + $0x10] sm:$0xff]  ;;  %v395_v5 = vld [vmem:[%s374_s22 + $0x8] sm:$0xff]  ;;  %s917_s13 = sshll.u32 %s1240_s17, 1  ;;  %s912_s18 = sshll.u32 %s1270_s12, 3 }
  0x20   : > { %967 = vmatpush3.msra.mxu0 %v397_v1  ;;  %v476_v3 = vld [vmem:[%s1252_s25 + $0x18] sm:$0xff]  ;;  %v475_v4 = vld [vmem:[%s1252_s25 + $0x10] sm:$0xff]  ;;  %v474_v6 = vld [vmem:[%s1252_s25 + $0x8] sm:$0xff]  ;;  %s911_s19 = sshll.u32 %s1270_s12, 4  ;;  %s1281_s26 = scalar_lea.vmem [#allocation4], %s912_s18 }
  0x21   : > { %968 = vmatprep.subr.mxu0 %v1139_v0  ;;  %978 = vmatpush3.msra.mxu1 %v476_v3  ;;  %v394_v7 = vld [vmem:[%s374_s22] sm:$0xff]  ;;  %v930_v9 = vld [vmem:[%s1252_s25 + $0x38] sm:$0xff]  ;;  %v929_v11 = vld [vmem:[%s1252_s25 + $0x30] sm:$0xff]  ;;  %s378_s22 = scalar_lea.vmem %s1385_s3, %s917_s13  ;;  %s343_s10 = scalar_lea.vmem [#allocation2], %s911_s19 }
  0x22   : > { %969 = vmatpush3.msra.mxu0 %v396_v2  ;;  %979 = vmatprep.subr.mxu1 %v1139_v0  ;;  %v473_v10 = vld [vmem:[%s1252_s25] sm:$0xff]  ;;  %v928_v12 = vld [vmem:[%s1252_s25 + $0x28] sm:$0xff]  ;;  %s950_s18 = sshll.u32 %s1211_s9, 8 }
  0x23   : > { %970 = vmatprep.subr.mxu0 %v1139_v0  ;;  %980 = vmatpush3.msra.mxu1 %v475_v4  ;;  %v927_v13 = vld [vmem:[%s1252_s25 + $0x20] sm:$0xff]  ;;  %s382_s25 = scalar_lea.vmem %s1386_s4, %s917_s13  ;;  %s708_s13 = sshll.u32 %s343_s10, 4  ;;  %s1291_s13 = int_to_ptr.vmem [resolvable:$true] %s708_s13 }
  0x24   : > { %971 = vmatpush3.msra.mxu0 %v395_v5  ;;  %981 = vmatprep.subr.mxu1 %v1139_v0  ;;  %v925_v15 = vld [vmem:[%s378_s22] ss:$0 sm:$0xff]  ;;  %v934_v23 = vld [vmem:[%s378_s22 + $0x1] ss:$0 sm:$0xff]  ;;  %s1298_s22 = scalar_lea.hbm %s1371_s5, %s950_s18  ;;  %s1047_s24 = scalar_lea.vmem %s1291_s13, 256 }
  0x25   : > { %972 = vmatprep.subr.mxu0 %v1139_v0  ;;  %982 = vmatpush3.msra.mxu1 %v474_v6  ;;  %v926_v16 = vld [vmem:[%s382_s25] ss:$0 sm:$0xff]  ;;  %v937_v26 = vld [vmem:[%s382_s25 + $0x1] ss:$0 sm:$0xff]  ;;  %p1048_p11 = scmp.ne.s32.totalorder %s1291_s13, %s1047_s24  ;;  %s1141_s25 = smov [#allocation2]  }
  0x26   : > { %973 = vmatpush3.msra.mxu0 %v394_v7  ;;  %983 = vmatprep.subr.mxu1 %v1139_v0 }
  0x27   : > { %975 = vmatmul.mubr.msk.f32.vlgmr.msra.gmra.mxu0 %vm398_vm1, %v393_v8  ;;  %988 = vmatprep.subr.mxu0 %v1139_v0  ;;  %p1049_p12 = pnand %p1048_p11, %p1228_p5 }
  0x28   : > { %989 = vmatpush3.msra.mxu0 %v930_v9  ;;  %984 = vmatpush3.msra.mxu1 %v473_v10 }
  0x29   : > { %990 = vmatprep.subr.mxu0 %v1139_v0  ;;  %986 = vmatmul.mubr.msk.f32.vlgmr.msra.gmra.mxu1 %vm398_vm1, %v393_v8  ;;  %p1050_p13 = pneg %p1049_p12 }
  0x2a   : > { %991 = vmatpush3.msra.mxu0 %v929_v11  ;;  %996 = vmatprep.mubr.msk.f32.mxu0 %vm1140_vm0, %v1139_v0 }
  0x2b   : > { %992 = vmatprep.subr.mxu0 %v1139_v0 }
  0x2c   : > { %993 = vmatpush3.msra.mxu0 %v928_v12 }
  0x2d   : > { %994 = vmatprep.subr.mxu0 %v1139_v0 }
  0x2e   : > { %995 = vmatpush3.msra.mxu0 %v927_v13 }
  0x2f   : > { %997 = vmatmul.mubr.msk.f32.vlgmr.msra.gmra.mxu0 %vm398_vm1, %v393_v8 }
  0xe7   : > { %v468_v14 = vpop.f32.mrf.mxu0 }
  0xe8   : > { %472 = vst.msk [vmem:[%s1281_s26] sm:$0xff] %vm398_vm1, %v468_v14 }
  0xe9   : > { %v976_v17 = vpop.f32.mrf.mxu0  ;;  %v543_v18 = vpop.f32.mrf.mxu1 }
  0xea   : > { %548 = vst.msk [vmem:[%s343_s10] sm:$0xff] %vm547_vm2, %v543_v18  ;;  %v556_v19 = vmul.f32 %v925_v15, %v543_v18  ;;  %v569_v20 = vmul.f32 %v926_v16, %v543_v18 }
  0xeb   : > { %v987_v21 = vpop.f32.mrf.mxu1 }
  0xec   : > { %v557_v22 = vsel %vm547_vm2, %v556_v19, 0.0  ;;  %v570_v24 = vsel %vm547_vm2, %v569_v20, 0.0 }
  0xed   : > { %558 = vadd.xlane.f32.xlu0 %v557_v22 }
  0xef   : > { %v645_v25 = vpop.f32.mrf.mxu0 }
  0xf0   : > { %932 = vst.msk [vmem:[%s343_s10 + $0x8] sm:$0xff] %vm547_vm2, %v645_v25  ;;  %v659_v27 = vmul.f32 %v934_v23, %v645_v25  ;;  %v673_v30 = vmul.f32 %v937_v26, %v645_v25  ;;  %s1051_s10 = sshll.u32 %s1141_s25, 4  ;;  %s1052_s10 = int_to_ptr.vmem [resolvable:$false] %s1051_s10 }
  0xf1   : > { %v998_v28 = vpop.f32.mrf.mxu0  ;;  %571 = vadd.xlane.f32.xlu0 %v570_v24  ;;  %s1053_s0 = scalar_lea.vmem %s1052_s10, 512  ;;  %p1054_p0 = scmp.lt.s32.totalorder %s1291_s13, %s1052_s10 }
  0xf2   : > { %v660_v29 = vsel %vm547_vm2, %v659_v27, 0.0  ;;  %v674_v31 = vsel %vm547_vm2, %v673_v30, 0.0  ;;  %p1055_p1 = scmp.lt.s32.totalorder %s1053_s0, %s1047_s24 }
  0xf3   : > { %661 = vadd.xlane.f32.xlu1 %v660_v29 }
  0xf4   : > { %p1056_p2 = por %p1055_p1, %p1054_p0 }
  0xf6   : > { %p1057_p3 = pnand %p1056_p2, %p1050_p13 }
  0xf7   : > { %675 = vadd.xlane.f32.xlu1 %v674_v31 }
  0xf8   : > { %1060 = shalt.err (!%p1057_p3)
}
  0xf9   : > { %s1061_s18 = scalar_lea.hbm %s1298_s22, 256  ;;  %s1065_s25 = scalar_lea.hbm %s1371_s5, 512 }
  0xfa   : > { %p1062_p4 = scmp.ne.s32.totalorder %s1298_s22, %s1061_s18  ;;  %p1066_p9 = scmp.lt.s32.totalorder %s1298_s22, %s1371_s5 }
  0xfb   : > { %p1067_p10 = scmp.lt.s32.totalorder %s1065_s25, %s1061_s18 }
  0xfc   : > { %p1063_p7 = pnand %p1062_p4, %p1228_p5 }
  0xfd   : > { %p1068_p11 = por %p1067_p10, %p1066_p9 }
  0xfe   : > { %p1064_p8 = pneg %p1063_p7 }
 0x100   : > { %p1069_p12 = pnand %p1068_p11, %p1064_p8 }
 0x102   : > { %1072 = shalt.err (!%p1069_p12)
}
 0x103   : > { %s1142_s0 = smov 128   ;;  %s1143_s24 = smov 8  }
 0x104   : > { %s1387_s10 = scalar_lea.sflag [#allocation3], %s1270_s12  ;;  %s1388_s20 = sshll.u32 %s1211_s9, 7 }
 0x105   : > { %999 = dma.vmem_to_hbm [thread:$0]  (%p1228_p5), %s1291_s13, 256, %s1298_s22, %s1387_s10, %s1142_s0, %s1142_s0, %s1143_s24  }
 0x106   : > { %s722_s18 = scalar_lea.hbm %s1372_s6, %s1388_s20  ;;  %s724_s21 = sshll.u32 %s1281_s26, 4  ;;  %s725_s21 = int_to_ptr.vmem [resolvable:$true] %s724_s21 }
 0x107   : > { %s685_s25 = scalar_lea.sflag [#allocation5], %s1270_s12  ;;  %s1073_s1 = scalar_lea.vmem %s725_s21, 128 }
 0x108   : > { %p1074_p13 = scmp.ne.s32.totalorder %s725_s21, %s1073_s1  ;;  %s1144_s2 = smov [#allocation4]  }
 0x109   : > { %s1077_s3 = sshll.u32 %s1144_s2, 4  ;;  %s1078_s3 = int_to_ptr.vmem [resolvable:$false] %s1077_s3 }
 0x10a   : > { %p1075_p0 = pnand %p1074_p13, %p1228_p5  ;;  %s1079_s4 = scalar_lea.vmem %s1078_s3, 256 }
 0x10b   : > { %p1080_p2 = scmp.lt.s32.totalorder %s725_s21, %s1078_s3  ;;  %p1081_p3 = scmp.lt.s32.totalorder %s1079_s4, %s1073_s1 }
 0x10c   : > { %p1076_p1 = pneg %p1075_p0 }
 0x10d   : > { %p1082_p4 = por %p1081_p3, %p1080_p2 }
 0x10f   : > { %p1083_p7 = pnand %p1082_p4, %p1076_p1 }
 0x111   : > { %1086 = shalt.err (!%p1083_p7)
}
 0x112   : > { %s1087_s9 = scalar_lea.hbm %s722_s18, 128  ;;  %s1091_s13 = scalar_lea.hbm %s1372_s6, 256 }
 0x113   : > { %p1088_p8 = scmp.ne.s32.totalorder %s722_s18, %s1087_s9  ;;  %p1092_p11 = scmp.lt.s32.totalorder %s722_s18, %s1372_s6 }
 0x114   : > { %p1093_p12 = scmp.lt.s32.totalorder %s1091_s13, %s1087_s9 }
 0x115   : > { %p1089_p9 = pnand %p1088_p8, %p1228_p5 }
 0x116   : > { %p1094_p13 = por %p1093_p12, %p1092_p11 }
 0x117   : > { %p1090_p10 = pneg %p1089_p9 }
 0x119   : > { %p1095_p0 = pnand %p1094_p13, %p1090_p10 }
 0x11b   : > { %1098 = shalt.err (!%p1095_p0)
}
 0x11c   : > { %1000 = dma.vmem_to_hbm [thread:$0]  (%p1228_p5), %s725_s21, 128, %s722_s18, %s685_s25   ;;  %vm560_vm3 = vcmask 7168  }
 0x11d   : > { %s948_s1 = sshll.u32 %s1240_s17, 4 }
 0x11e   : > { %s387_s4 = scalar_lea.vmem %s1373_s7, %s948_s1  ;;  %s392_s20 = scalar_lea.vmem %s1374_s8, %s948_s1 }
 0x176   : > { %v559_v32 = vpop.xlane.xlu0 %558 }
 0x177   : > { %561 = vst.msk [vmem:[%s387_s4] sm:$0xff] %vm560_vm3, %v559_v32 }
 0x17a   : > { %v572_v33 = vpop.xlane.xlu0 %571 }
 0x17b   : > { %573 = vst.msk [vmem:[%s392_s20] sm:$0xff] %vm560_vm3, %v572_v33 }
 0x17c   : > { %v662_v34 = vpop.xlane.xlu1 %661 }
 0x17d   : > { %935 = vst.msk [vmem:[%s387_s4 + $0x8] sm:$0xff] %vm560_vm3, %v662_v34 }
 0x180   : > { %v676_v35 = vpop.xlane.xlu1 %675 }
 0x181   : > { %938 = vst.msk [vmem:[%s392_s20 + $0x8] sm:$0xff] %vm560_vm3, %v676_v35 }
 0x182 PF: > { %p1010_p5 = scmp.ge.s32.totalorder %s1137_s30, 2  ;;  %s742_s15 = sand.u32 1, %s1125_s27  }
 0x183   : > { %s743_s17 = scalar_lea.sflag [#allocation3], %s742_s15 }
 0x184   : > { %p1004_p1 = pnand %p1010_p5, %p1232_p6 }
 0x186   : > { %p1005_p2 = pneg %p1004_p1 }
 0x188   : > { %1116 = dma.done.wait (%p1005_p2), %s743_s17, 256  }
 0x189   : > { %1118 = vsyncadd (%p1005_p2), %s743_s17, 4294967040  ;;  %s752_s19 = scalar_lea.sflag [#allocation5], %s742_s15 }
 0x18a   : > { %1120 = dma.done.wait (%p1005_p2), %s752_s19, 128  }
 0x18b   : > { %1122 = vsyncadd (%p1005_p2), %s752_s19, 4294967168  ;;  %p22_p3 = scmp.ge.s32.totalorder %s1215_s11, 4   ;;  %s1389_s27 = smov %s1129_s28 }
 0x18c   : > { %s1390_s28 = smov %s1133_s29  ;;  %s1391_s29 = smov %s1226_s14 }
 0x18d   : > { %s1392_s30 = smov %s1215_s11  ;;  %24 = sbr.rel (!%p22_p3) target bundleno = 11 (0xb), region = 131 }
 0x192   :  { %773 = vsyncpa [#allocation3], 1 }
 0x193   :  { %775 = vsyncpa [#allocation3 + $0x1], 1 }
 0x194   :  { %776 = vsyncpa [#allocation5], 1 }
 0x195   :  { %778 = vsyncpa [#allocation5 + $0x1], 1 }

</bundles_post_ra>
